<compile_context>
chip_gen: v7x
topology: tpu7x:2x2x1
jax: 0.10.0
libtpu: 0.0.40
codegen_flags: <defaults>
</compile_context>

<pallas_src>
import jax
import jax.numpy as jnp
from jax.experimental import pallas as pl
from jax.experimental.pallas import tpu as pltpu


def _diffor_kernel(xT_ref, w1_ref, b1_ref, w2_ref, b2_ref, o_ref):
    # xT : (D_in, TB)  input tile, batch on lanes
    # w1 : (H, D_in)   hidden.weight (PyTorch layout), resident in VMEM
    # b1 : (H, 1)      hidden.bias as a column
    # w2 : (H, 1)      linear.weight transposed to a column
    # b2 : (1, 1)      linear.bias, scalar in SMEM
    # o  : (1, TB)     lane-dense output tile
    xT = xT_ref[...]                       # (D_in, TB)
    w1 = w1_ref[...]                       # (H, D_in)

    # hidden = relu(W1 @ x + b1): unrolled K=D_in broadcast-MAC on the VPU.
    acc = w1[:, 0:1] * xT[0:1, :]          # (H,1)*(1,TB) -> (H, TB)
    for d in range(1, w1.shape[1]):        # D_in is tiny and static -> full unroll
        acc = acc + w1[:, d:d + 1] * xT[d:d + 1, :]
    h = jnp.maximum(acc + b1_ref[...], 0.0)                 # bias add + ReLU (VPU)

    # out = sigmoid(w2 . h + b2): VPU multiply + sublane (XLU) reduction, no N=1 matmul.
    y = jnp.sum(h * w2_ref[...], axis=0, keepdims=True)     # (1, TB)
    y = y + b2_ref[0, 0]                                     # scalar bias from SMEM
    o_ref[...] = jax.nn.sigmoid(y).astype(o_ref.dtype)       # EUP logistic


def diffor_forward(x, w1, b1, w2, b2, *, block_b=1024):
    """DiffOR forward.

    x : (B, D_in) float32
    w1: (H, D_in)  -- hidden.weight (PyTorch layout)
    b1: (H,)       -- hidden.bias
    w2: (1, H)     -- linear.weight (PyTorch layout)
    b2: (1,)       -- linear.bias
    Returns (B, 1) float32.
    """
    B, D_in = x.shape
    H = w1.shape[0]

    # Layout plumbing (cheap wrapper-side reshapes/transposes, no compute hoisting):
    xT = x.T                               # (D_in, B): batch on the lane axis
    b1k = b1.reshape(H, 1)
    w2k = w2.reshape(H, 1)                 # column vector for the sublane reduction
    b2k = b2.reshape(1, 1)

    # Pad the batch to a multiple of 128 so every tile (and the output store) is
    # lane-dense; padded lanes are sliced off below.
    B_pad = B if B % 128 == 0 else ((B + 127) // 128) * 128
    if B_pad != B:
        xT = jnp.pad(xT, ((0, 0), (0, B_pad - B)))

    # Largest 128-multiple tile (<= block_b) that divides the padded batch.
    TB = max(128, (min(block_b, B_pad) // 128) * 128)
    while B_pad % TB != 0:
        TB -= 128
    grid = (B_pad // TB,)

    out = pl.pallas_call(
        _diffor_kernel,
        out_shape=jax.ShapeDtypeStruct((1, B_pad), jnp.float32),
        grid=grid,
        in_specs=[
            pl.BlockSpec((D_in, TB), lambda i: (0, i)),          # streamed input tile
            pl.BlockSpec((H, D_in), lambda i: (0, 0)),           # resident weights
            pl.BlockSpec((H, 1), lambda i: (0, 0)),
            pl.BlockSpec((H, 1), lambda i: (0, 0)),
            pl.BlockSpec(memory_space=pltpu.MemorySpace.SMEM),   # b2 scalar
        ],
        out_specs=pl.BlockSpec((1, TB), lambda i: (0, i)),       # lane-dense output
        compiler_params=pltpu.CompilerParams(
            dimension_semantics=("parallel",)),                  # shards across v7x's 2 TCs
    )(xT, w1, b1k, w2k, b2k)

    return out[0, :B].reshape(B, 1)


def init_params(key, input_size=3, hidden_size=256):
    """Deterministic init matching nn.Linear's U(-1/sqrt(fan_in), 1/sqrt(fan_in)),
    stored in native PyTorch layout."""
    k1, k2, k3, k4 = jax.random.split(key, 4)
    lim1 = 1.0 / jnp.sqrt(jnp.float32(input_size))
    lim2 = 1.0 / jnp.sqrt(jnp.float32(hidden_size))
    w1 = jax.random.uniform(k1, (hidden_size, input_size), jnp.float32, -lim1, lim1)
    b1 = jax.random.uniform(k2, (hidden_size,), jnp.float32, -lim1, lim1)
    w2 = jax.random.uniform(k3, (1, hidden_size), jnp.float32, -lim2, lim2)
    b2 = jax.random.uniform(k4, (1,), jnp.float32, -lim2, lim2)
    return w1, b1, w2, b2


def _reference(x, w1, b1, w2, b2):
    # Same math as the PyTorch forward: x @ W.T + b at every Linear.
    return jax.nn.sigmoid(jnp.maximum(x @ w1.T + b1, 0.0) @ w2.T + b2)


if __name__ == "__main__":
    key = jax.random.PRNGKey(0)
    k_x, k_p = jax.random.split(key)

    batch, input_size, hidden_size = 256, 3, 256
    x = jax.random.uniform(k_x, (batch, input_size), jnp.float32)   # "proba_tensor"
    w1, b1, w2, b2 = init_params(k_p, input_size, hidden_size)

    # block_b=128 -> grid=(2,): exercises the batch-tiled, lane-dense pipeline.
    out = diffor_forward(x, w1, b1, w2, b2, block_b=128)
    out = jax.block_until_ready(out)
    ref = _reference(x, w1, b1, w2, b2)
    assert out.shape == (batch, 1)
    assert jnp.allclose(out, ref, atol=1e-5, rtol=1e-5)

    # Also check a ragged batch (B not a multiple of 128): exercises the padded path.
    x_small = jax.random.uniform(jax.random.PRNGKey(1), (37, input_size), jnp.float32)
    out_small = jax.block_until_ready(diffor_forward(x_small, w1, b1, w2, b2))
    ref_small = _reference(x_small, w1, b1, w2, b2)
    assert out_small.shape == (37, 1)
    assert jnp.allclose(out_small, ref_small, atol=1e-5, rtol=1e-5)

    print("KERNEL_OK")
</pallas_src>

<mosaic_0001>
module attributes {stable_mosaic.version = 11 : i64} {
  func.func @_diffor_kernel(%arg0: i32, %arg1: memref<3x128xf32, #tpu.memory_space<vmem>>, %arg2: memref<256x3xf32, #tpu.memory_space<vmem>>, %arg3: memref<256x1xf32, #tpu.memory_space<vmem>>, %arg4: memref<256x1xf32, #tpu.memory_space<vmem>>, %arg5: memref<1x1xf32, #tpu.memory_space<smem>>, %arg6: memref<1x128xf32, #tpu.memory_space<vmem>>) attributes {dimension_semantics = [#tpu.dimension_semantics<parallel>], iteration_bounds = array<i64: 2>, scalar_prefetch = 0 : i64, scratch_operands = 0 : i64, tpu.core_type = #tpu.core_type<tc>, window_params = [{transform_indices = @transform_0, window_bounds = array<i64: 3, 128>}, {pipeline_mode = #tpu.pipeline_mode<synchronous>, transform_indices = @transform_1, window_bounds = array<i64: 256, 3>}, {pipeline_mode = #tpu.pipeline_mode<synchronous>, transform_indices = @transform_2, window_bounds = array<i64: 256, 1>}, {pipeline_mode = #tpu.pipeline_mode<synchronous>, transform_indices = @transform_3, window_bounds = array<i64: 256, 1>}, {transform_indices = @transform_4, window_bounds = array<i64: 1, 1>}, {transform_indices = @transform_5, window_bounds = array<i64: 1, 128>}]} {
    %c0 = arith.constant 0 : index
    %c0_0 = arith.constant 0 : index
    %0 = vector.load %arg1[%c0, %c0_0] : memref<3x128xf32, #tpu.memory_space<vmem>>, vector<3x128xf32>
    %c0_1 = arith.constant 0 : index
    %c0_2 = arith.constant 0 : index
    %1 = vector.load %arg2[%c0_1, %c0_2] : memref<256x3xf32, #tpu.memory_space<vmem>>, vector<256x3xf32>
    %2 = vector.extract_strided_slice %1 {offsets = [0, 0], sizes = [256, 1], strides = [1, 1]} : vector<256x3xf32> to vector<256x1xf32>
    %3 = vector.extract_strided_slice %0 {offsets = [0, 0], sizes = [1, 128], strides = [1, 1]} : vector<3x128xf32> to vector<1x128xf32>
    %4 = vector.broadcast %2 : vector<256x1xf32> to vector<256x128xf32>
    %5 = vector.broadcast %3 : vector<1x128xf32> to vector<256x128xf32>
    %6 = arith.mulf %4, %5 : vector<256x128xf32>
    %7 = vector.extract_strided_slice %1 {offsets = [0, 1], sizes = [256, 1], strides = [1, 1]} : vector<256x3xf32> to vector<256x1xf32>
    %8 = vector.extract_strided_slice %0 {offsets = [1, 0], sizes = [1, 128], strides = [1, 1]} : vector<3x128xf32> to vector<1x128xf32>
    %9 = vector.broadcast %7 : vector<256x1xf32> to vector<256x128xf32>
    %10 = vector.broadcast %8 : vector<1x128xf32> to vector<256x128xf32>
    %11 = arith.mulf %9, %10 : vector<256x128xf32>
    %12 = arith.addf %6, %11 : vector<256x128xf32>
    %13 = vector.extract_strided_slice %1 {offsets = [0, 2], sizes = [256, 1], strides = [1, 1]} : vector<256x3xf32> to vector<256x1xf32>
    %14 = vector.extract_strided_slice %0 {offsets = [2, 0], sizes = [1, 128], strides = [1, 1]} : vector<3x128xf32> to vector<1x128xf32>
    %15 = vector.broadcast %13 : vector<256x1xf32> to vector<256x128xf32>
    %16 = vector.broadcast %14 : vector<1x128xf32> to vector<256x128xf32>
    %17 = arith.mulf %15, %16 : vector<256x128xf32>
    %18 = arith.addf %12, %17 : vector<256x128xf32>
    %c0_3 = arith.constant 0 : index
    %c0_4 = arith.constant 0 : index
    %19 = vector.load %arg3[%c0_3, %c0_4] : memref<256x1xf32, #tpu.memory_space<vmem>>, vector<256x1xf32>
    %20 = vector.broadcast %19 : vector<256x1xf32> to vector<256x128xf32>
    %21 = arith.addf %18, %20 : vector<256x128xf32>
    %cst = arith.constant 0.000000e+00 : f32
    %22 = vector.broadcast %cst : f32 to vector<256x128xf32>
    %23 = arith.maximumf %21, %22 : vector<256x128xf32>
    %c0_5 = arith.constant 0 : index
    %c0_6 = arith.constant 0 : index
    %24 = vector.load %arg4[%c0_5, %c0_6] : memref<256x1xf32, #tpu.memory_space<vmem>>, vector<256x1xf32>
    %25 = vector.broadcast %24 : vector<256x1xf32> to vector<256x128xf32>
    %26 = arith.mulf %23, %25 : vector<256x128xf32>
    %cst_7 = arith.constant dense<0.000000e+00> : vector<128xf32>
    %27 = vector.multi_reduction <add>, %26, %cst_7 [0] : vector<256x128xf32> to vector<128xf32>
    %28 = vector.shape_cast %27 : vector<128xf32> to vector<1x128xf32>
    %c0_8 = arith.constant 0 : index
    %c0_9 = arith.constant 0 : index
    %29 = memref.load %arg5[%c0_8, %c0_9] : memref<1x1xf32, #tpu.memory_space<smem>>
    %30 = vector.broadcast %29 : f32 to vector<1x128xf32>
    %31 = arith.addf %28, %30 : vector<1x128xf32>
    %32 = arith.negf %31 : vector<1x128xf32>
    %33 = math.exp %32 : vector<1x128xf32>
    %cst_10 = arith.constant 1.000000e+00 : f32
    %34 = vector.broadcast %cst_10 : f32 to vector<1x128xf32>
    %35 = arith.addf %34, %33 : vector<1x128xf32>
    %36 = arith.divf %34, %35 : vector<1x128xf32>
    %c0_11 = arith.constant 0 : index
    %c0_12 = arith.constant 0 : index
    %37 = vector.load %arg6[%c0_11, %c0_12] : memref<1x128xf32, #tpu.memory_space<vmem>>, vector<1x128xf32>
    tpu.vector_store %arg6[%c0_11, %c0_12], %36 {strides = array<i32>} : memref<1x128xf32, #tpu.memory_space<vmem>>, vector<1x128xf32>,
    return
  }
  func.func @transform_0(%arg0: i32) -> (i32, i32) {
    %c0_i32 = arith.constant 0 : i32
    %c0_i32_0 = arith.constant 0 : i32
    return %c0_i32, %arg0 : i32, i32
  }
  func.func @transform_1(%arg0: i32) -> (i32, i32) {
    %c0_i32 = arith.constant 0 : i32
    %c0_i32_0 = arith.constant 0 : i32
    %c0_i32_1 = arith.constant 0 : i32
    return %c0_i32, %c0_i32_0 : i32, i32
  }
  func.func @transform_2(%arg0: i32) -> (i32, i32) {
    %c0_i32 = arith.constant 0 : i32
    %c0_i32_0 = arith.constant 0 : i32
    %c0_i32_1 = arith.constant 0 : i32
    return %c0_i32, %c0_i32_0 : i32, i32
  }
  func.func @transform_3(%arg0: i32) -> (i32, i32) {
    %c0_i32 = arith.constant 0 : i32
    %c0_i32_0 = arith.constant 0 : i32
    %c0_i32_1 = arith.constant 0 : i32
    return %c0_i32, %c0_i32_0 : i32, i32
  }
  func.func @transform_4(%arg0: i32) -> (i32, i32) {
    %c0_i32 = arith.constant 0 : i32
    %c0_i32_0 = arith.constant 0 : i32
    %c0_i32_1 = arith.constant 0 : i32
    return %c0_i32, %c0_i32_0 : i32, i32
  }
  func.func @transform_5(%arg0: i32) -> (i32, i32) {
    %c0_i32 = arith.constant 0 : i32
    %c0_i32_0 = arith.constant 0 : i32
    return %c0_i32, %arg0 : i32, i32
  }
}

</mosaic_0001>

<bundles_post_ra>
// kernel: tpu_custom_call.1
= control target key start
LH: loop header
LB: loop body
LE: loop exit
PB: predicated region body
PF: predicated region fallthrough
CT: control target
= control target key end

     0   :  { %s2549_s0 = inlined_call_operand.vmem [shape: f32[3,256], index: 0, kind: input, shape index: {}]   ;;  %s2550_s1 = inlined_call_operand.vmem [shape: f32[256,3], index: 1, kind: input, shape index: {}]   ;;  %s2551_s2 = inlined_call_operand.vmem [shape: f32[256,1], index: 2, kind: input, shape index: {}]   ;;  %s2552_s3 = inlined_call_operand.vmem [shape: f32[256,1], index: 3, kind: input, shape index: {}]   ;;  %s2553_s4 = inlined_call_operand.<no memory space> [shape: f32[1,1], index: 4, kind: input, shape index: {}]   ;;  %s2554_s5 = inlined_call_operand.hbm [shape: f32[1,256], index: 5, kind: output, shape index: {}]  }
   0x1   :  { %10 = sst [smem:[#allocation2]] %s2553_s4 }
   0x2   :  { %11 = vsyncpa [#allocation4], 0 }
   0x3   :  { %13 = vsyncpa [#allocation4 + $0x1], 0  ;;  %s1599_s20 = smov 0   ;;  %s1601_s21 = smov 0  }
   0x4   :  { %s1603_s22 = smov 0   ;;  %s1605_s23 = smov 0  }
   0x5 LB: > { %s1620_s4 = sadd.s32 4294967295, %s1560_s23   ;;  %s1436_s24 = sadd.s32 4294967294, %s1560_s23   ;;  %s1560_s23 = sphi %s1605_s23, %s2692_s23   ;;  %s1556_s22 = sphi %s1603_s22, %s2691_s22   ;;  %s1552_s21 = sphi %s1601_s21, %s2690_s21   ;;  %s1548_s20 = sphi %s1599_s20, %s2689_s20  }
   0x6   : > { %s1624_s25 = sadd.s32 1, %s1560_s23   ;;  %s136_s26 = sadd.s32 1, %s1556_s22 }
   0x7   : > { %s133_s27 = ssub.s32 %s1560_s23, %s1624_s25  ;;  %p146_p0 = scmp.ne.s32.totalorder %s1556_s22, %s1552_s21 }
   0x8   : > { %p134_p1 = scmp.eq.s32.totalorder %s133_s27, 0  ;;  %p147_p2 = scmp.eq.s32.totalorder %s1620_s4, 1 }
   0x9   : > { %p152_p3 = scmp.ne.s32.totalorder %s1552_s21, %s1548_s20  ;;  %p153_p4 = scmp.eq.s32.totalorder %s1436_s24, 1 }
   0xa   : > { %s1635_s28 = scalar_select %p134_p1, %s1556_s22, %s136_s26  }
   0xb   : > { %p1637_p5 = por %p147_p2, %p146_p0  ;;  %p1641_p6 = por %p153_p4, %p152_p3 }
   0xc   : > { %p1439_p7 = scmp.ge.s32.totalorder %s1560_s23, 1  ;;  %p190_p8 = scmp.lt.s32.totalorder %s1560_s23, 3 }
   0xe   : > { %p191_p9 = pnand %p1439_p7, %p190_p8 }
  0x10   : > { %194 = sbr.rel (%p191_p9) target bundleno = 536 (0x218), region = 40 }
  0x17   : > { %v1650_v0 = vld [vmem:[%s2550_s1 + $0x10] sm:$0xff]  ;;  %v1655_v1 = vld [vmem:[%s2550_s1] sm:$0xff]  ;;  %v1562_v2 = vmov 1   ;;  %v1563_v3 = vmov 0   ;;  %v1663_v4 = vld [vmem:[%s2550_s1 + $0x18] sm:$0xff]  ;;  %v1564_v20 = vmov 2  }
  0x18   : > { %1488 = vset.pattern.permute.xlu0 %v1562_v2  ;;  %1487 = vset.pattern.permute.xlu1 %v1563_v3  ;;  %v1670_v5 = vld [vmem:[%s2550_s1 + $0x28] sm:$0xff]  ;;  %v1677_v6 = vld [vmem:[%s2550_s1 + $0x38] sm:$0xff]  ;;  %v225_v21 = vld [vmem:[%s2550_s1 + $0x20] sm:$0xff]  ;;  %p216_p10 = scmp.lt.s32.totalorder %s1620_s4, 1  ;;  %s214_s17 = sand.u32 1, %s1552_s21  }
  0x19   : > { %265 = vperm.xlu1 %1487, %v1650_v0   ;;  %450 = vperm.xlu0 %1488, %v1655_v1   ;;  %v1684_v7 = vld [vmem:[%s2550_s1 + $0x48] sm:$0xff]  ;;  %v1691_v8 = vld [vmem:[%s2550_s1 + $0x58] sm:$0xff]  ;;  %v227_v22 = vld [vmem:[%s2550_s1 + $0x30] sm:$0xff]  ;;  %s1442_s18 = sshll.u32 %s1620_s4, 4  ;;  %s215_s19 = scalar_lea.vmem [#allocation3], %s214_s17 }
  0x1a   : > { %v1698_v9 = vld [vmem:[%s2550_s1 + $0x68] sm:$0xff]  ;;  %v1705_v10 = vld [vmem:[%s2550_s1 + $0x78] sm:$0xff]  ;;  %v229_v23 = vld [vmem:[%s2550_s1 + $0x40] sm:$0xff]  ;;  %s217_s16 = scalar_select %p216_p10, %s1620_s4, 1 }
  0x1b   : > { %v1712_v11 = vld [vmem:[%s2550_s1 + $0x88] sm:$0xff]  ;;  %v1719_v12 = vld [vmem:[%s2550_s1 + $0x98] sm:$0xff]  ;;  %v231_v24 = vld [vmem:[%s2550_s1 + $0x50] sm:$0xff]  ;;  %s1381_s24 = sshll.u32 %s215_s19, 4  ;;  %s2507_s6 = scalar_lea.hbm %s2554_s5, %s1442_s18  ;;  %s2509_s24 = int_to_ptr.vmem [resolvable:$true] %s1381_s24 }
  0x1c   : > { %v1726_v13 = vld [vmem:[%s2550_s1 + $0xa8] sm:$0xff]  ;;  %v1733_v14 = vld [vmem:[%s2550_s1 + $0xb8] sm:$0xff]  ;;  %v233_v25 = vld [vmem:[%s2550_s1 + $0x60] sm:$0xff]  ;;  %s1440_s26 = sshll.u32 %s217_s16, 2  ;;  %s1358_s16 = sld [smem:[#allocation2]] }
  0x1d   : > { %270 = vperm.xlu1 %1487, %v1663_v4   ;;  %462 = vperm.xlu0 %1488, %v1663_v4   ;;  %v1740_v15 = vld [vmem:[%s2550_s1 + $0xc8] sm:$0xff]  ;;  %v1747_v16 = vld [vmem:[%s2550_s1 + $0xd8] sm:$0xff]  ;;  %v235_v26 = vld [vmem:[%s2550_s1 + $0x70] sm:$0xff]  ;;  %s219_s11 = scalar_lea.vmem %s2549_s0, %s1440_s26  ;;  %s1369_s7 = scalar_lea.sflag [#allocation4], %s214_s17 }
  0x1e   : > { %v1754_v17 = vld [vmem:[%s2550_s1 + $0xe8] sm:$0xff]  ;;  %v1761_v18 = vld [vmem:[%s2550_s1 + $0xf8] sm:$0xff]  ;;  %v237_v27 = vld [vmem:[%s2550_s1 + $0x80] sm:$0xff]  ;;  %s1498_s8 = scalar_lea.vmem %s2509_s24, 16  ;;  %s1565_s4 = smov [#allocation3]  }
  0x1f   : > { %v222_v19 = vld [vmem:[%s2550_s1 + $0x8] sm:$0xff]  ;;  %v239_v28 = vld [vmem:[%s2550_s1 + $0x90] sm:$0xff]  ;;  %v241_v29 = vld [vmem:[%s2550_s1 + $0xa0] sm:$0xff]  ;;  %p1499_p11 = scmp.ne.s32.totalorder %s2509_s24, %s1498_s8  ;;  %s1502_s9 = sshll.u32 %s1565_s4, 4  ;;  %s1503_s9 = int_to_ptr.vmem [resolvable:$false] %s1502_s9 }
  0x20   : > { %v243_v30 = vld [vmem:[%s2550_s1 + $0xb0] sm:$0xff]  ;;  %v245_v31 = vld [vmem:[%s2550_s1 + $0xc0] sm:$0xff]  ;;  %s1504_s10 = scalar_lea.vmem %s1503_s9, 32  ;;  %p1505_p0 = scmp.lt.s32.totalorder %s2509_s24, %s1503_s9 }
  0x21   : > { %280 = vperm.xlu1 %1487, %v1670_v5   ;;  %470 = vperm.xlu0 %1488, %v1670_v5   ;;  %v1805_v32 = vld [vmem:[%s2550_s1 + $0xd0] sm:$0xff]  ;;  %v1811_v33 = vld [vmem:[%s2550_s1 + $0xe0] sm:$0xff]  ;;  %p1500_p12 = pnand %p1499_p11, %p1637_p5  ;;  %p1506_p1 = scmp.lt.s32.totalorder %s1504_s10, %s1498_s8 }
  0x22   : > { %v1818_v34 = vld [vmem:[%s2550_s1 + $0xf0] sm:$0xff] }
  0x23   : > { %p1501_p13 = pneg %p1500_p12  ;;  %p1507_p2 = por %p1506_p1, %p1505_p0 }
  0x25   : > { %290 = vperm.xlu1 %1487, %v1677_v6   ;;  %478 = vperm.xlu0 %1488, %v1677_v6   ;;  %p1508_p3 = pnand %p1507_p2, %p1501_p13 }
  0x29   : > { %300 = vperm.xlu1 %1487, %v1684_v7   ;;  %486 = vperm.xlu0 %1488, %v1684_v7  }
  0x2d   : > { %310 = vperm.xlu1 %1487, %v1691_v8   ;;  %494 = vperm.xlu0 %1488, %v1691_v8  }
  0x31   : > { %320 = vperm.xlu1 %1487, %v1698_v9   ;;  %502 = vperm.xlu0 %1488, %v1698_v9  }
  0x35   : > { %330 = vperm.xlu1 %1487, %v1705_v10   ;;  %510 = vperm.xlu0 %1488, %v1705_v10  }
  0x39   : > { %340 = vperm.xlu1 %1487, %v1712_v11   ;;  %518 = vperm.xlu0 %1488, %v1712_v11  }
  0x3d   : > { %350 = vperm.xlu1 %1487, %v1719_v12   ;;  %526 = vperm.xlu0 %1488, %v1719_v12  }
  0x41   : > { %360 = vperm.xlu1 %1487, %v1726_v13   ;;  %534 = vperm.xlu0 %1488, %v1726_v13  }
  0x45   : > { %370 = vperm.xlu1 %1487, %v1733_v14   ;;  %542 = vperm.xlu0 %1488, %v1733_v14  }
  0x49   : > { %380 = vperm.xlu1 %1487, %v1740_v15   ;;  %550 = vperm.xlu0 %1488, %v1740_v15  }
  0x4d   : > { %390 = vperm.xlu1 %1487, %v1747_v16   ;;  %558 = vperm.xlu0 %1488, %v1747_v16  }
  0x51   : > { %400 = vperm.xlu1 %1487, %v1754_v17   ;;  %566 = vperm.xlu0 %1488, %v1754_v17  }
  0x55   : > { %410 = vperm.xlu1 %1487, %v1761_v18   ;;  %574 = vperm.xlu0 %1488, %v1761_v18  }
  0x59   : > { %1489 = vset.pattern.permute.xlu1 %v1562_v2  ;;  %1491 = vset.pattern.permute.xlu0 %v1564_v20 }
  0x5a   : > { %454 = vperm.xlu1 %1489, %v222_v19   ;;  %650 = vperm.xlu0 %1491, %v222_v19  }
  0x5e   : > { %458 = vperm.xlu1 %1489, %v1650_v0   ;;  %662 = vperm.xlu0 %1491, %v225_v21  }
  0x62   : > { %466 = vperm.xlu1 %1489, %v225_v21   ;;  %670 = vperm.xlu0 %1491, %v227_v22  }
  0x66   : > { %474 = vperm.xlu1 %1489, %v227_v22   ;;  %678 = vperm.xlu0 %1491, %v229_v23  }
  0x6a   : > { %482 = vperm.xlu1 %1489, %v229_v23   ;;  %686 = vperm.xlu0 %1491, %v231_v24  }
  0x6e   : > { %490 = vperm.xlu1 %1489, %v231_v24   ;;  %694 = vperm.xlu0 %1491, %v233_v25  }
  0x72   : > { %498 = vperm.xlu1 %1489, %v233_v25   ;;  %702 = vperm.xlu0 %1491, %v235_v26  }
  0x76   : > { %506 = vperm.xlu1 %1489, %v235_v26   ;;  %710 = vperm.xlu0 %1491, %v237_v27  }
  0x7a   : > { %514 = vperm.xlu1 %1489, %v237_v27   ;;  %718 = vperm.xlu0 %1491, %v239_v28  }
  0x7e   : > { %522 = vperm.xlu1 %1489, %v239_v28   ;;  %726 = vperm.xlu0 %1491, %v241_v29  }
  0x82   : > { %530 = vperm.xlu1 %1489, %v241_v29   ;;  %734 = vperm.xlu0 %1491, %v243_v30  }
  0x86   : > { %538 = vperm.xlu1 %1489, %v243_v30   ;;  %742 = vperm.xlu0 %1491, %v245_v31  }
  0x8a   : > { %546 = vperm.xlu1 %1489, %v245_v31   ;;  %750 = vperm.xlu0 %1491, %v1805_v32  }
  0x8e   : > { %554 = vperm.xlu1 %1489, %v1805_v32   ;;  %758 = vperm.xlu0 %1491, %v1811_v33  }
  0x92   : > { %562 = vperm.xlu1 %1489, %v1811_v33   ;;  %766 = vperm.xlu0 %1491, %v1818_v34  }
  0x96   : > { %570 = vperm.xlu1 %1489, %v1818_v34   ;;  %1492 = vset.pattern.permute.xlu0 %v1563_v3 }
  0x97   : > { %255 = vperm.xlu0 %1492, %v1655_v1  }
  0x98   : > { %v1825_v35 = vpop.permute.xlu1 %265  ;;  %v1827_v36 = vpop.permute.xlu0 %450 }
  0x9a   : > { %1490 = vset.pattern.permute.xlu1 %v1564_v20 }
  0x9b   : > { %646 = vperm.xlu1 %1490, %v1655_v1   ;;  %260 = vperm.xlu0 %1492, %v222_v19   ;;  %v852_v19 = vld [vmem:[%s2551_s2 + $0x58] sm:$0xff] }
  0x9c   : > { %v1830_v37 = vpop.permute.xlu1 %270  ;;  %v1832_v38 = vpop.permute.xlu0 %462 }
  0x9f   : > { %654 = vperm.xlu1 %1490, %v1650_v0   ;;  %275 = vperm.xlu0 %1492, %v225_v21  }
  0xa0   : > { %v1835_v39 = vpop.permute.xlu1 %280  ;;  %v1837_v40 = vpop.permute.xlu0 %470 }
  0xa3   : > { %658 = vperm.xlu1 %1490, %v1663_v4   ;;  %285 = vperm.xlu0 %1492, %v227_v22   ;;  %v841_v4 = vld [vmem:[%s2551_s2] sm:$0xff]  ;;  %v847_v22 = vld [vmem:[%s2551_s2 + $0x30] sm:$0xff] }
  0xa4   : > { %v1840_v41 = vpop.permute.xlu1 %290  ;;  %v1842_v42 = vpop.permute.xlu0 %478 }
  0xa7   : > { %666 = vperm.xlu1 %1490, %v1670_v5   ;;  %295 = vperm.xlu0 %1492, %v229_v23   ;;  %v844_v5 = vld [vmem:[%s2551_s2 + $0x18] sm:$0xff]  ;;  %v854_v23 = vld [vmem:[%s2551_s2 + $0x68] sm:$0xff] }
  0xa8   : > { %v1845_v43 = vpop.permute.xlu1 %300  ;;  %v1847_v44 = vpop.permute.xlu0 %486 }
  0xab   : > { %674 = vperm.xlu1 %1490, %v1677_v6   ;;  %305 = vperm.xlu0 %1492, %v231_v24  }
  0xac   : > { %v1850_v45 = vpop.permute.xlu1 %310  ;;  %v1852_v46 = vpop.permute.xlu0 %494 }
  0xaf   : > { %682 = vperm.xlu1 %1490, %v1684_v7   ;;  %315 = vperm.xlu0 %1492, %v233_v25  }
  0xb0   : > { %v1855_v47 = vpop.permute.xlu1 %320  ;;  %v1857_v48 = vpop.permute.xlu0 %502 }
  0xb3   : > { %690 = vperm.xlu1 %1490, %v1691_v8   ;;  %325 = vperm.xlu0 %1492, %v235_v26   ;;  %v846_v8 = vld [vmem:[%s2551_s2 + $0x28] sm:$0xff]  ;;  %v849_v26 = vld [vmem:[%s2551_s2 + $0x40] sm:$0xff] }
  0xb4   : > { %v1860_v49 = vpop.permute.xlu1 %330  ;;  %v1862_v50 = vpop.permute.xlu0 %510 }
  0xb7   : > { %698 = vperm.xlu1 %1490, %v1698_v9   ;;  %335 = vperm.xlu0 %1492, %v237_v27   ;;  %v856_v27 = vld [vmem:[%s2551_s2 + $0x78] sm:$0xff] }
  0xb8   : > { %v1865_v51 = vpop.permute.xlu1 %340  ;;  %v1867_v52 = vpop.permute.xlu0 %518 }
  0xbb   : > { %706 = vperm.xlu1 %1490, %v1705_v10   ;;  %345 = vperm.xlu0 %1492, %v239_v28  }
  0xbc   : > { %v1870_v53 = vpop.permute.xlu1 %350  ;;  %v1872_v54 = vpop.permute.xlu0 %526 }
  0xbd   : > { %2557 = vst [vmem:[#allocation6_spill] sm:$0xff] %v1870_v53  ;;  %2558 = vst [vmem:[#allocation7_spill] sm:$0xff] %v1872_v54 }
  0xbf   : > { %714 = vperm.xlu1 %1490, %v1712_v11   ;;  %355 = vperm.xlu0 %1492, %v241_v29   ;;  %v842_v11 = vld [vmem:[%s2551_s2 + $0x8] sm:$0xff] }
  0xc0   : > { %v1875_v55 = vpop.permute.xlu1 %360  ;;  %v1877_v56 = vpop.permute.xlu0 %534 }
  0xc1   : > { %2559 = vst [vmem:[#allocation8_spill] sm:$0xff] %v1875_v55  ;;  %2560 = vst [vmem:[#allocation9_spill] sm:$0xff] %v1877_v56  ;;  %v1120_v56 = vld [vmem:[%s2552_s3 + $0xb8] sm:$0xff] }
  0xc3   : > { %722 = vperm.xlu1 %1490, %v1719_v12   ;;  %365 = vperm.xlu0 %1492, %v243_v30   ;;  %v848_v12 = vld [vmem:[%s2551_s2 + $0x38] sm:$0xff]  ;;  %v851_v30 = vld [vmem:[%s2551_s2 + $0x50] sm:$0xff] }
  0xc4   : > { %v1880_v57 = vpop.permute.xlu1 %370  ;;  %v1882_v58 = vpop.permute.xlu0 %542 }
  0xc5   : > { %2561 = vst [vmem:[#allocation10_spill] sm:$0xff] %v1880_v57  ;;  %2562 = vst [vmem:[#allocation11_spill] sm:$0xff] %v1882_v58  ;;  %v1118_v58 = vld [vmem:[%s2552_s3 + $0xa8] sm:$0xff] }
  0xc7   : > { %730 = vperm.xlu1 %1490, %v1726_v13   ;;  %375 = vperm.xlu0 %1492, %v245_v31   ;;  %v858_v31 = vld [vmem:[%s2551_s2 + $0x88] sm:$0xff] }
  0xc8   : > { %v1885_v59 = vpop.permute.xlu1 %380  ;;  %v1887_v60 = vpop.permute.xlu0 %550 }
  0xc9   : > { %2563 = vst [vmem:[#allocation12_spill] sm:$0xff] %v1885_v59  ;;  %2564 = vst [vmem:[#allocation13_spill] sm:$0xff] %v1887_v60 }
  0xcb   : > { %738 = vperm.xlu1 %1490, %v1733_v14   ;;  %385 = vperm.xlu0 %1492, %v1805_v32  }
  0xcc   : > { %v1891_v61 = vpop.permute.xlu1 %390  ;;  %v1893_v62 = vpop.permute.xlu0 %558 }
  0xcd   : > { %2565 = vst [vmem:[#allocation14_spill] sm:$0xff] %v1891_v61  ;;  %2566 = vst [vmem:[#allocation15_spill] sm:$0xff] %v1893_v62 }
  0xcf   : > { %746 = vperm.xlu1 %1490, %v1740_v15   ;;  %395 = vperm.xlu0 %1492, %v1811_v33   ;;  %v843_v15 = vld [vmem:[%s2551_s2 + $0x10] sm:$0xff] }
  0xd0   : > { %v1897_v63 = vpop.permute.xlu1 %400  ;;  %v1899_v0 = vpop.permute.xlu0 %566 }
  0xd1   : > { %2567 = vst [vmem:[#allocation16_spill] sm:$0xff] %v1897_v63  ;;  %2568 = vst [vmem:[#allocation17_spill] sm:$0xff] %v1899_v0  ;;  %v220_v63 = vld [vmem:[%s219_s11] sm:$0x7] }
  0xd3   : > { %754 = vperm.xlu1 %1490, %v1747_v16   ;;  %405 = vperm.xlu0 %1492, %v1818_v34   ;;  %v853_v34 = vld [vmem:[%s2551_s2 + $0x60] sm:$0xff] }
  0xd4   : > { %v1903_v1 = vpop.permute.xlu1 %410  ;;  %v1905_v2 = vpop.permute.xlu0 %574 }
  0xd5   : > { %2569 = vst [vmem:[#allocation18_spill] sm:$0xff] %v1903_v1  ;;  %2570 = vst [vmem:[#allocation19_spill] sm:$0xff] %v1905_v2  ;;  %v1099_v1 = vld [vmem:[%s2552_s3 + $0x10] sm:$0xff] }
  0xd7   : > { %762 = vperm.xlu1 %1490, %v1754_v17   ;;  %875 = vperm.xlu0 %1492, %v841_v4   ;;  %v860_v4 = vld [vmem:[%s2551_s2 + $0x98] sm:$0xff] }
  0xd9   : > { %v1914_v6 = vpop.permute.xlu1 %454  ;;  %v1916_v7 = vpop.permute.xlu0 %650 }
  0xdb   : > { %770 = vperm.xlu1 %1490, %v1761_v18   ;;  %890 = vperm.xlu0 %1492, %v844_v5   ;;  %v845_v18 = vld [vmem:[%s2551_s2 + $0x20] sm:$0xff] }
  0xdd   : > { %v1922_v9 = vpop.permute.xlu1 %458  ;;  %v1924_v10 = vpop.permute.xlu0 %662 }
  0xdf   : > { %1493 = vset.pattern.permute.xlu1 %v1563_v3  ;;  %900 = vperm.xlu0 %1492, %v846_v8   ;;  %v850_v3 = vld [vmem:[%s2551_s2 + $0x48] sm:$0xff] }
  0xe0   : > { %880 = vperm.xlu1 %1493, %v842_v11   ;;  %v855_v11 = vld [vmem:[%s2551_s2 + $0x70] sm:$0xff] }
  0xe1   : > { %v1933_v13 = vpop.permute.xlu1 %466  ;;  %v1935_v14 = vpop.permute.xlu0 %670 }
  0xe3   : > { %910 = vperm.xlu0 %1492, %v848_v12   ;;  %v862_v12 = vld [vmem:[%s2551_s2 + $0xa8] sm:$0xff] }
  0xe4   : > { %885 = vperm.xlu1 %1493, %v843_v15  }
  0xe5   : > { %v1943_v16 = vpop.permute.xlu1 %474  ;;  %v1945_v17 = vpop.permute.xlu0 %678 }
  0xe7   : > { %920 = vperm.xlu0 %1492, %v850_v3  }
  0xe8   : > { %895 = vperm.xlu1 %1493, %v845_v18   ;;  %v857_v18 = vld [vmem:[%s2551_s2 + $0x80] sm:$0xff] }
  0xe9   : > { %v1953_v20 = vpop.permute.xlu1 %482  ;;  %v1955_v21 = vpop.permute.xlu0 %686 }
  0xea   : > { %2571 = vst [vmem:[#allocation20_spill] sm:$0xff] %v1955_v21 }
  0xeb   : > { %930 = vperm.xlu0 %1492, %v852_v19   ;;  %v1098_v19 = vld [vmem:[%s2552_s3 + $0x8] sm:$0xff] }
  0xec   : > { %905 = vperm.xlu1 %1493, %v847_v22  }
  0xed   : > { %v1963_v24 = vpop.permute.xlu1 %490  ;;  %v1965_v25 = vpop.permute.xlu0 %694 }
  0xee   : > { %2572 = vst [vmem:[#allocation21_spill] sm:$0xff] %v1965_v25 }
  0xef   : > { %940 = vperm.xlu0 %1492, %v854_v23  }
  0xf0   : > { %915 = vperm.xlu1 %1493, %v849_v26   ;;  %v859_v26 = vld [vmem:[%s2551_s2 + $0x90] sm:$0xff] }
  0xf1   : > { %v1973_v28 = vpop.permute.xlu1 %498  ;;  %v1975_v29 = vpop.permute.xlu0 %702 }
  0xf2   : > { %2573 = vst [vmem:[#allocation22_spill] sm:$0xff] %v1973_v28  ;;  %2574 = vst [vmem:[#allocation23_spill] sm:$0xff] %v1975_v29 }
  0xf3   : > { %950 = vperm.xlu0 %1492, %v856_v27   ;;  %v1100_v27 = vld [vmem:[%s2552_s3 + $0x18] sm:$0xff] }
  0xf4   : > { %925 = vperm.xlu1 %1493, %v851_v30  }
  0xf5   : > { %v1983_v32 = vpop.permute.xlu1 %506  ;;  %v1985_v33 = vpop.permute.xlu0 %710 }
  0xf6   : > { %2575 = vst [vmem:[#allocation24_spill] sm:$0xff] %v1983_v32  ;;  %2576 = vst [vmem:[#allocation25_spill] sm:$0xff] %v1985_v33 }
  0xf7   : > { %960 = vperm.xlu0 %1492, %v858_v31  }
  0xf8   : > { %935 = vperm.xlu1 %1493, %v853_v34   ;;  %v861_v34 = vld [vmem:[%s2551_s2 + $0xa0] sm:$0xff] }
  0xf9   : > { %v1993_v5 = vpop.permute.xlu1 %514  ;;  %v1995_v8 = vpop.permute.xlu0 %718 }
  0xfa   : > { %2577 = vst [vmem:[#allocation26_spill] sm:$0xff] %v1993_v5  ;;  %2578 = vst [vmem:[#allocation27_spill] sm:$0xff] %v1995_v8 }
  0xfb   : > { %970 = vperm.xlu0 %1492, %v860_v4   ;;  %v1102_v4 = vld [vmem:[%s2552_s3 + $0x28] sm:$0xff] }
  0xfc   : > { %945 = vperm.xlu1 %1493, %v855_v11   ;;  %v413_v11 = vlaneseq }
  0xfd   : > { %v2003_v15 = vpop.permute.xlu1 %522  ;;  %v2005_v3 = vpop.permute.xlu0 %726 }
  0xfe   : > { %2579 = vst [vmem:[#allocation28_spill] sm:$0xff] %v2003_v15  ;;  %2580 = vst [vmem:[#allocation29_spill] sm:$0xff] %v2005_v3  ;;  %v1122_v15 = vld [vmem:[%s2552_s3 + $0xc8] sm:$0xff] }
  0xff   : > { %980 = vperm.xlu0 %1492, %v862_v12  }
 0x100   : > { %955 = vperm.xlu1 %1493, %v857_v18  }
 0x101   : > { %v2013_v22 = vpop.permute.xlu1 %530  ;;  %v2015_v23 = vpop.permute.xlu0 %734 }
 0x102   : > { %2581 = vst [vmem:[#allocation30_spill] sm:$0xff] %v2013_v22  ;;  %2582 = vst [vmem:[#allocation31_spill] sm:$0xff] %v2015_v23  ;;  %v1121_v22 = vld [vmem:[%s2552_s3 + $0xc0] sm:$0xff] }
 0x103   : > { %1136 = vperm.xlu0 %1492, %v1098_v19   ;;  %v1097_v19 = vld [vmem:[%s2552_s3] sm:$0xff] }
 0x104   : > { %965 = vperm.xlu1 %1493, %v859_v26   ;;  %v1104_v26 = vld [vmem:[%s2552_s3 + $0x38] sm:$0xff] }
 0x105   : > { %v2024_v30 = vpop.permute.xlu1 %538  ;;  %v2026_v31 = vpop.permute.xlu0 %742 }
 0x106   : > { %2583 = vst [vmem:[#allocation32_spill] sm:$0xff] %v2024_v30  ;;  %2584 = vst [vmem:[#allocation33_spill] sm:$0xff] %v2026_v31  ;;  %v1119_v30 = vld [vmem:[%s2552_s3 + $0xb0] sm:$0xff] }
 0x107   : > { %1146 = vperm.xlu0 %1492, %v1100_v27   ;;  %v414_v27 = vshrl.u32 %v413_v11, 7 }
 0x108   : > { %975 = vperm.xlu1 %1493, %v861_v34  }
 0x109   : > { %v2035_v12 = vpop.permute.xlu1 %546  ;;  %v2037_v18 = vpop.permute.xlu0 %750  ;;  %v775_v62 = vsub.s32 2, %v414_v27 }
 0x10a   : > { %2585 = vst [vmem:[#allocation34_spill] sm:$0xff] %v2035_v12  ;;  %2586 = vst [vmem:[#allocation35_spill] sm:$0xff] %v2037_v18  ;;  %v579_v18 = vsub.s32 1, %v414_v27 }
 0x10b   : > { %1156 = vperm.xlu0 %1492, %v1102_v4   ;;  %v1106_v4 = vld [vmem:[%s2552_s3 + $0x48] sm:$0xff] }
 0x10c   : > { %1131 = vperm.xlu1 %1493, %v1097_v19   ;;  %v415_v19 = vsub.s32 0, %v414_v27  ;;  %v2075_v31 = vrot.slane %v220_v63, %v579_v18 }
 0x10d   : > { %v2045_v34 = vpop.permute.xlu1 %554  ;;  %v2047_v2 = vpop.permute.xlu0 %758 }
 0x10e   : > { %2587 = vst [vmem:[#allocation36_spill] sm:$0xff] %v2045_v34  ;;  %2588 = vst [vmem:[#allocation37_spill] sm:$0xff] %v2047_v2  ;;  %v1101_v2 = vld [vmem:[%s2552_s3 + $0x20] sm:$0xff]  ;;  %v581_v27 = vmul.f32 %v2075_v31, %v1827_v36  ;;  %v1107_v36 = vld [vmem:[%s2552_s3 + $0x50] sm:$0xff] }
 0x10f   : > { %1166 = vperm.xlu0 %1492, %v1104_v26   ;;  %v2068_v26 = vrot.slane %v220_v63, %v415_v19  ;;  %v1105_v19 = vld [vmem:[%s2552_s3 + $0x40] sm:$0xff] }
 0x110   : > { %1141 = vperm.xlu1 %1493, %v1099_v1   ;;  %v1108_v1 = vld [vmem:[%s2552_s3 + $0x58] sm:$0xff] }
 0x111   : > { %v2058_v11 = vpop.permute.xlu1 %562  ;;  %v2060_v0 = vpop.permute.xlu0 %766 }
 0x112   : > { %2589 = vst [vmem:[#allocation38_spill] sm:$0xff] %v2058_v11  ;;  %v1103_v11 = vld [vmem:[%s2552_s3 + $0x30] sm:$0xff] }
 0x113   : > { %1176 = vperm.xlu0 %1492, %v1106_v4   ;;  %v2083_v4 = vrot.slane %v220_v63, %v775_v62 }
 0x114   : > { %1151 = vperm.xlu1 %1493, %v1101_v2   ;;  %v1110_v2 = vld [vmem:[%s2552_s3 + $0x68] sm:$0xff] }
 0x115   : > { %v2070_v61 = vpop.permute.xlu1 %570 }
 0x116   : > { %v256_v34 = vpop.permute.xlu0 %255 }
 0x117   : > { %v417_v60 = vmul.f32 %v2068_v26, %v256_v34  ;;  %1186 = vperm.xlu0 %1492, %v1108_v1  }
 0x118   : > { %1161 = vperm.xlu1 %1493, %v1103_v11   ;;  %v1112_v11 = vld [vmem:[%s2552_s3 + $0x78] sm:$0xff] }
 0x119   : > { %v613_v12 = vadd.f32 %v581_v27, %v417_v60  ;;  %v1109_v60 = vld [vmem:[%s2552_s3 + $0x60] sm:$0xff] }
 0x11a   : > { %v647_v59 = vpop.permute.xlu1 %646  ;;  %v2088_v18 = vpop.permute.xlu0 %260 }
 0x11b   : > { %v777_v34 = vmul.f32 %v2083_v4, %v647_v59  ;;  %1196 = vperm.xlu0 %1492, %v1110_v2   ;;  %v1114_v59 = vld [vmem:[%s2552_s3 + $0x88] sm:$0xff] }
 0x11c   : > { %1171 = vperm.xlu1 %1493, %v1105_v19   ;;  %v1111_v19 = vld [vmem:[%s2552_s3 + $0x70] sm:$0xff] }
 0x11d   : > { %v2097_v62 = vadd.f32 %v777_v34, %v613_v12  ;;  %v1116_v12 = vld [vmem:[%s2552_s3 + $0x98] sm:$0xff] }
 0x11e   : > { %v2099_v63 = vpop.permute.xlu1 %654  ;;  %v2101_v1 = vpop.permute.xlu0 %275 }
 0x11f   : > { %1206 = vperm.xlu0 %1492, %v1112_v11  }
 0x120   : > { %1181 = vperm.xlu1 %1493, %v1107_v36   ;;  %v1117_v36 = vld [vmem:[%s2552_s3 + $0xa0] sm:$0xff] }
 0x122   : > { %v2109_v2 = vpop.permute.xlu1 %658  ;;  %v2111_v27 = vpop.permute.xlu0 %285 }
 0x123   : > { %1216 = vperm.xlu0 %1492, %v1114_v59   ;;  %v1113_v59 = vld [vmem:[%s2552_s3 + $0x80] sm:$0xff] }
 0x124   : > { %1191 = vperm.xlu1 %1493, %v1109_v60  }
 0x126   : > { %v2119_v34 = vpop.permute.xlu1 %666  ;;  %v2121_v11 = vpop.permute.xlu0 %295 }
 0x127   : > { %1226 = vperm.xlu0 %1492, %v1116_v12   ;;  %v1115_v12 = vld [vmem:[%s2552_s3 + $0x90] sm:$0xff] }
 0x128   : > { %1201 = vperm.xlu1 %1493, %v1111_v19  }
 0x12a   : > { %v2129_v60 = vpop.permute.xlu1 %674  ;;  %v2131_v23 = vpop.permute.xlu0 %305 }
 0x12b   : > { %1231 = vperm.xlu0 %1492, %v1117_v36   ;;  %v863_v36 = vld [vmem:[%s2551_s2 + $0xb0] sm:$0xff] }
 0x12c   : > { %1211 = vperm.xlu1 %1493, %v1113_v59  }
 0x12e   : > { %v2139_v19 = vpop.permute.xlu1 %682  ;;  %v2141_v57 = vpop.permute.xlu0 %315 }
 0x12f   : > { %1236 = vperm.xlu0 %1492, %v1118_v58   ;;  %v864_v58 = vld [vmem:[%s2551_s2 + $0xb8] sm:$0xff] }
 0x130   : > { %1221 = vperm.xlu1 %1493, %v1115_v12  }
 0x132   : > { %v2149_v59 = vpop.permute.xlu1 %690  ;;  %v2151_v3 = vpop.permute.xlu0 %325 }
 0x133   : > { %2590 = vst [vmem:[#allocation39_spill] sm:$0xff] %v2149_v59  ;;  %2591 = vst [vmem:[#allocation40_spill] sm:$0xff] %v2151_v3  ;;  %1241 = vperm.xlu0 %1492, %v1119_v30   ;;  %v865_v30 = vld [vmem:[%s2551_s2 + $0xc0] sm:$0xff] }
 0x134   : > { %985 = vperm.xlu1 %1493, %v863_v36  }
 0x136   : > { %v2159_v12 = vpop.permute.xlu1 %698  ;;  %v2161_v55 = vpop.permute.xlu0 %335 }
 0x137   : > { %2592 = vst [vmem:[#allocation41_spill] sm:$0xff] %v2159_v12  ;;  %2593 = vst [vmem:[#allocation42_spill] sm:$0xff] %v2161_v55  ;;  %1246 = vperm.xlu0 %1492, %v1120_v56   ;;  %v866_v56 = vld [vmem:[%s2551_s2 + $0xc8] sm:$0xff] }
 0x138   : > { %990 = vperm.xlu1 %1493, %v864_v58  }
 0x13a   : > { %v2169_v36 = vpop.permute.xlu1 %706  ;;  %v2171_v8 = vpop.permute.xlu0 %345 }
 0x13b   : > { %2594 = vst [vmem:[#allocation43_spill] sm:$0xff] %v2169_v36  ;;  %2595 = vst [vmem:[#allocation44_spill] sm:$0xff] %v2171_v8  ;;  %1251 = vperm.xlu0 %1492, %v1121_v22   ;;  %v1123_v8 = vld [vmem:[%s2552_s3 + $0xd0] sm:$0xff]  ;;  %v611_v36 = vmul.f32 %v2075_v31, %v2070_v61 }
 0x13c   : > { %995 = vperm.xlu1 %1493, %v865_v30   ;;  %v867_v22 = vld [vmem:[%s2551_s2 + $0xd0] sm:$0xff] }
 0x13d   : > { %v1127_v61 = vld [vmem:[%s2552_s3 + $0xf0] sm:$0xff] }
 0x13e   : > { %v2179_v58 = vpop.permute.xlu1 %714  ;;  %v2181_v33 = vpop.permute.xlu0 %355 }
 0x13f   : > { %2596 = vst [vmem:[#allocation45_spill] sm:$0xff] %v2179_v58  ;;  %2597 = vst [vmem:[#allocation46_spill] sm:$0xff] %v2181_v33  ;;  %1256 = vperm.xlu0 %1492, %v1122_v15   ;;  %v1124_v33 = vld [vmem:[%s2552_s3 + $0xd8] sm:$0xff] }
 0x140   : > { %1000 = vperm.xlu1 %1493, %v866_v56   ;;  %v868_v15 = vld [vmem:[%s2551_s2 + $0xd8] sm:$0xff] }
 0x142   : > { %v2189_v30 = vpop.permute.xlu1 %722  ;;  %v2191_v54 = vpop.permute.xlu0 %365 }
 0x143   : > { %2598 = vst [vmem:[#allocation47_spill] sm:$0xff] %v2189_v30  ;;  %2599 = vst [vmem:[#allocation48_spill] sm:$0xff] %v2191_v54  ;;  %1261 = vperm.xlu0 %1492, %v1123_v8   ;;  %v1125_v54 = vld [vmem:[%s2552_s3 + $0xe0] sm:$0xff] }
 0x144   : > { %1005 = vperm.xlu1 %1493, %v867_v22   ;;  %v869_v8 = vld [vmem:[%s2551_s2 + $0xe0] sm:$0xff] }
 0x146   : > { %v2199_v56 = vpop.permute.xlu1 %730  ;;  %v2201_v58 = vpop.permute.xlu0 %375 }
 0x147   : > { %2600 = vst [vmem:[#allocation49_spill] sm:$0xff] %v2199_v56  ;;  %2601 = vst [vmem:[#allocation50_spill] sm:$0xff] %v2201_v58  ;;  %1266 = vperm.xlu0 %1492, %v1124_v33   ;;  %v1126_v58 = vld [vmem:[%s2552_s3 + $0xe8] sm:$0xff] }
 0x148   : > { %1010 = vperm.xlu1 %1493, %v868_v15   ;;  %v870_v33 = vld [vmem:[%s2551_s2 + $0xe8] sm:$0xff] }
 0x14a   : > { %v2209_v22 = vpop.permute.xlu1 %738  ;;  %v2211_v30 = vpop.permute.xlu0 %385 }
 0x14b   : > { %2602 = vst [vmem:[#allocation51_spill] sm:$0xff] %v2209_v22  ;;  %2603 = vst [vmem:[#allocation52_spill] sm:$0xff] %v2211_v30  ;;  %1271 = vperm.xlu0 %1492, %v1125_v54   ;;  %v1128_v30 = vld [vmem:[%s2552_s3 + $0xf8] sm:$0xff]  ;;  %v871_v54 = vld [vmem:[%s2551_s2 + $0xf0] sm:$0xff] }
 0x14c   : > { %1015 = vperm.xlu1 %1493, %v869_v8  }
 0x14e   : > { %v2219_v15 = vpop.permute.xlu1 %746  ;;  %v2221_v56 = vpop.permute.xlu0 %395 }
 0x14f   : > { %2604 = vst [vmem:[#allocation53_spill] sm:$0xff] %v2219_v15  ;;  %2605 = vst [vmem:[#allocation54_spill] sm:$0xff] %v2221_v56  ;;  %1276 = vperm.xlu0 %1492, %v1126_v58   ;;  %v807_v58 = vmul.f32 %v2083_v4, %v2060_v0  ;;  %v872_v56 = vld [vmem:[%s2551_s2 + $0xf8] sm:$0xff] }
 0x150   : > { %1020 = vperm.xlu1 %1493, %v870_v33  }
 0x152   : > { %v2229_v8 = vpop.permute.xlu1 %754  ;;  %v406_v22 = vpop.permute.xlu0 %405 }
 0x153   : > { %2606 = vst [vmem:[#allocation55_spill] sm:$0xff] %v2229_v8  ;;  %v447_v15 = vmul.f32 %v2068_v26, %v406_v22  ;;  %1286 = vperm.xlu0 %1492, %v1128_v30  }
 0x154   : > { %1025 = vperm.xlu1 %1493, %v871_v54  }
 0x155   : > { %v643_v33 = vadd.f32 %v611_v36, %v447_v15 }
 0x156   : > { %v2239_v5 = vpop.permute.xlu1 %762  ;;  %v876_v29 = vpop.permute.xlu0 %875 }
 0x157   : > { %2607 = vst [vmem:[#allocation56_spill] sm:$0xff] %v2239_v5  ;;  %v2241_v8 = vadd.f32 %v807_v58, %v643_v33 }
 0x158   : > { %1030 = vperm.xlu1 %1493, %v872_v56  }
 0x159   : > { %2608 = vst [vmem:[#allocation57_spill] sm:$0xff] %v2241_v8 }
 0x15a   : > { %v2246_v30 = vpop.permute.xlu1 %770  ;;  %v2248_v22 = vpop.permute.xlu0 %890 }
 0x15b   : > { %2609 = vst [vmem:[#allocation58_spill] sm:$0xff] %v2246_v30 }
 0x15c   : > { %1281 = vperm.xlu1 %1493, %v1127_v61  }
 0x15e   : > { %v2250_v0 = vpop.permute.xlu0 %900 }
 0x15f   : > { %v881_v36 = vpop.permute.xlu1 %880 }
 0x162   : > { %v2252_v15 = vpop.permute.xlu0 %910 }
 0x163   : > { %v886_v54 = vpop.permute.xlu1 %885 }
 0x166   : > { %v2254_v5 = vpop.permute.xlu0 %920 }
 0x167   : > { %2610 = vst [vmem:[#allocation59_spill] sm:$0xff] %v2254_v5  ;;  %v2256_v58 = vpop.permute.xlu1 %895 }
 0x16a   : > { %v2258_v56 = vpop.permute.xlu0 %930 }
 0x16b   : > { %2611 = vst [vmem:[#allocation60_spill] sm:$0xff] %v2258_v56  ;;  %v2260_v33 = vpop.permute.xlu1 %905  ;;  %v418_v56 = vmul.f32 %v2068_v26, %v2088_v18  ;;  %v422_v18 = vmul.f32 %v2068_v26, %v1835_v39  ;;  %v590_v39 = vmul.f32 %v2075_v31, %v1847_v44  ;;  %v780_v44 = vmul.f32 %v2083_v4, %v2109_v2 }
 0x16e   : > { %v2262_v8 = vpop.permute.xlu0 %940 }
 0x16f   : > { %2612 = vst [vmem:[#allocation61_spill] sm:$0xff] %v2262_v8  ;;  %v2264_v30 = vpop.permute.xlu1 %915  ;;  %v582_v8 = vmul.f32 %v2075_v31, %v1914_v6  ;;  %v586_v6 = vmul.f32 %v2075_v31, %v1837_v40  ;;  %v421_v40 = vmul.f32 %v2068_v26, %v2101_v1 }
 0x170   : > { %2613 = vst [vmem:[#allocation62_spill] sm:$0xff] %v2264_v30 }
 0x172   : > { %v2266_v55 = vpop.permute.xlu0 %950 }
 0x173   : > { %2614 = vst [vmem:[#allocation63_spill] sm:$0xff] %v2266_v55  ;;  %v2268_v61 = vpop.permute.xlu1 %925  ;;  %v614_v55 = vadd.f32 %v582_v8, %v418_v56  ;;  %v778_v8 = vmul.f32 %v2083_v4, %v1916_v7  ;;  %v428_v7 = vmul.f32 %v2068_v26, %v1850_v45  ;;  %v618_v45 = vadd.f32 %v586_v6, %v422_v18 }
 0x174   : > { %2615 = vst [vmem:[#allocation64_spill] sm:$0xff] %v2268_v61 }
 0x176   : > { %v2270_v53 = vpop.permute.xlu0 %960 }
 0x177   : > { %2616 = vst [vmem:[#allocation65_spill] sm:$0xff] %v2270_v53  ;;  %v2272_v12 = vpop.permute.xlu1 %935  ;;  %v419_v53 = vmul.f32 %v2068_v26, %v1825_v35  ;;  %v583_v35 = vmul.f32 %v2075_v31, %v1922_v9  ;;  %v592_v9 = vmul.f32 %v2075_v31, %v1852_v46 }
 0x178   : > { %2617 = vst [vmem:[#allocation66_spill] sm:$0xff] %v2272_v12  ;;  %v420_v12 = vmul.f32 %v2068_v26, %v1830_v37  ;;  %v588_v37 = vmul.f32 %v2075_v31, %v1842_v42  ;;  %v779_v42 = vmul.f32 %v2083_v4, %v2099_v63  ;;  %v782_v63 = vmul.f32 %v2083_v4, %v2119_v34 }
 0x179   : > { %v615_v1 = vadd.f32 %v583_v35, %v419_v53 }
 0x17a   : > { %v2274_v32 = vpop.permute.xlu0 %970 }
 0x17b   : > { %2618 = vst [vmem:[#allocation67_spill] sm:$0xff] %v2274_v32  ;;  %v2276_v25 = vpop.permute.xlu1 %945  ;;  %v584_v32 = vmul.f32 %v2075_v31, %v1832_v38  ;;  %v426_v38 = vmul.f32 %v2068_v26, %v1845_v43  ;;  %v585_v43 = vmul.f32 %v2075_v31, %v1933_v13  ;;  %v430_v13 = vmul.f32 %v2068_v26, %v1855_v47 }
 0x17c   : > { %2619 = vst [vmem:[#allocation68_spill] sm:$0xff] %v2276_v25  ;;  %v811_v53 = vadd.f32 %v779_v42, %v615_v1  ;;  %v591_v42 = vmul.f32 %v2075_v31, %v1963_v24 }
 0x17d   : > { %v616_v25 = vadd.f32 %v584_v32, %v420_v12  ;;  %v2323_v28 = vadd.f32 %v590_v39, %v426_v38  ;;  %v617_v46 = vadd.f32 %v585_v43, %v421_v40  ;;  %v423_v32 = vmul.f32 %v2068_v26, %v2111_v27 }
 0x17e   : > { %v2282_v5 = vpop.permute.xlu0 %980  ;;  %v1035_v47 = vadd.f32 %v886_v54, %v811_v53  ;;  %v432_v27 = vmul.f32 %v2068_v26, %v1860_v49  ;;  %v783_v54 = vmul.f32 %v2083_v4, %v1935_v14  ;;  %v589_v49 = vmul.f32 %v2075_v31, %v1953_v20 }
 0x17f   : > { %2620 = vst [vmem:[#allocation69_spill] sm:$0xff] %v2282_v5  ;;  %v2284_v3 = vpop.permute.xlu1 %955  ;;  %v424_v5 = vmul.f32 %v2068_v26, %v1840_v41  ;;  %v427_v14 = vmul.f32 %v2068_v26, %v2131_v23  ;;  %v786_v43 = vmul.f32 %v2083_v4, %v2139_v19 }
 0x180   : > { %2621 = vst [vmem:[#allocation70_spill] sm:$0xff] %v2284_v3  ;;  %v810_v3 = vadd.f32 %v778_v8, %v614_v55  ;;  %v2327_v55 = vadd.f32 %v592_v9, %v428_v7 }
 0x181   : > { %v620_v59 = vadd.f32 %v588_v37, %v424_v5  ;;  %v781_v5 = vmul.f32 %v2083_v4, %v1924_v10  ;;  %v425_v10 = vmul.f32 %v2068_v26, %v2121_v11  ;;  %v1067_v11 = vmax.f32 %v1035_v47, 0.0 }
 0x182   : > { %v1137_v56 = vpop.permute.xlu0 %1136  ;;  %v1034_v61 = vadd.f32 %v881_v36, %v810_v3  ;;  %v587_v3 = vmul.f32 %v2075_v31, %v1943_v16 }
 0x183   : > { %v2310_v41 = vpop.permute.xlu1 %965  ;;  %v813_v18 = vadd.f32 %v781_v5, %v617_v46  ;;  %v621_v40 = vadd.f32 %v589_v49, %v425_v10  ;;  %v2623_v5 = vld [vmem:[#allocation20_spill] sm:$0xff] }
 0x184   : > { %2622 = vst [vmem:[#allocation71_spill] sm:$0xff] %v2310_v41  ;;  %v1033_v41 = vadd.f32 %v876_v29, %v2097_v62  ;;  %v594_v29 = vmul.f32 %v2075_v31, %v1857_v48  ;;  %v812_v62 = vadd.f32 %v780_v44, %v616_v25  ;;  %v1066_v12 = vmax.f32 %v1034_v61, 0.0 }
 0x185   : > { %v596_v48 = vmul.f32 %v2075_v31, %v1862_v50  ;;  %v619_v16 = vadd.f32 %v587_v3, %v423_v32  ;;  %v784_v50 = vmul.f32 %v2083_v4, %v2129_v60  ;;  %v814_v61 = vadd.f32 %v782_v63, %v618_v45 }
 0x186   : > { %v1147_v30 = vpop.permute.xlu0 %1146  ;;  %v1065_v2 = vmax.f32 %v1033_v41, 0.0  ;;  %v1036_v25 = vadd.f32 %v2248_v22, %v812_v62  ;;  %v1290_v8 = vmul.f32 %v1137_v56, %v1066_v12  ;;  %v2348_v35 = vadd.f32 %v594_v29, %v430_v13  ;;  %v2625_v62 = vld [vmem:[#allocation39_spill] sm:$0xff] }
 0x187   : > { %v2325_v21 = vpop.permute.xlu1 %975  ;;  %v1037_v37 = vadd.f32 %v2256_v58, %v813_v18  ;;  %v2357_v22 = vadd.f32 %v596_v48, %v432_v27  ;;  %v434_v56 = vmul.f32 %v2068_v26, %v1865_v51  ;;  %v1038_v7 = vadd.f32 %v2250_v0, %v814_v61  ;;  %v2627_v18 = vld [vmem:[#allocation40_spill] sm:$0xff] }
 0x188   : > { %v1068_v20 = vmax.f32 %v1036_v25, 0.0  ;;  %v815_v60 = vadd.f32 %v783_v54, %v619_v16  ;;  %v785_v58 = vmul.f32 %v2083_v4, %v1945_v17  ;;  %v816_v51 = vadd.f32 %v784_v50, %v620_v59 }
 0x189   : > { %v1069_v44 = vmax.f32 %v1037_v37, 0.0  ;;  %v598_v0 = vmul.f32 %v2075_v31, %v1867_v52  ;;  %v623_v13 = vadd.f32 %v591_v42, %v427_v14  ;;  %v429_v17 = vmul.f32 %v2068_v26, %v2141_v57  ;;  %v2626_v57 = vld [vmem:[#allocation62_spill] sm:$0xff]  ;;  %v2631_v37 = vld [vmem:[#allocation41_spill] sm:$0xff]  ;;  %v2632_v14 = vld [vmem:[#allocation64_spill] sm:$0xff] }
 0x18a   : > { %v1157_v36 = vpop.permute.xlu0 %1156  ;;  %v1039_v1 = vadd.f32 %v2260_v33, %v815_v60  ;;  %v1292_v23 = vmul.f32 %v1147_v30, %v1068_v20  ;;  %v817_v32 = vadd.f32 %v785_v58, %v621_v40  ;;  %v1070_v24 = vmax.f32 %v1038_v7, 0.0  ;;  %v2624_v30 = vld [vmem:[#allocation22_spill] sm:$0xff] }
 0x18b   : > { %v1132_v6 = vpop.permute.xlu1 %1131  ;;  %v1040_v29 = vadd.f32 %v2252_v15, %v816_v51  ;;  %v787_v33 = vmul.f32 %v2083_v4, %v2623_v5  ;;  %v593_v3 = vmul.f32 %v2075_v31, %v2624_v30  ;;  %v788_v52 = vmul.f32 %v2083_v4, %v2625_v62  ;;  %v2639_v5 = vld [vmem:[#allocation66_spill] sm:$0xff] }
 0x18c   : > { %v1289_v34 = vmul.f32 %v1132_v6, %v1065_v2  ;;  %v818_v63 = vadd.f32 %v786_v43, %v2323_v28  ;;  %v1071_v2 = vmax.f32 %v1039_v1, 0.0  ;;  %v1041_v12 = vadd.f32 %v2626_v57, %v817_v32  ;;  %v2629_v28 = vld [vmem:[#allocation21_spill] sm:$0xff]  ;;  %v2634_v43 = vld [vmem:[#allocation42_spill] sm:$0xff]  ;;  %v2641_v57 = vld [vmem:[#allocation44_spill] sm:$0xff] }
 0x18d   : > { %v1294_v47 = vmul.f32 %v1157_v36, %v1070_v24  ;;  %v2384_v15 = vadd.f32 %v598_v0, %v434_v56  ;;  %v625_v10 = vadd.f32 %v593_v3, %v429_v17  ;;  %v431_v6 = vmul.f32 %v2068_v26, %v2627_v18  ;;  %v2636_v17 = vld [vmem:[#allocation23_spill] sm:$0xff]  ;;  %v2642_v18 = vld [vmem:[#allocation61_spill] sm:$0xff] }
 0x18e   : > { %v1321_v38 = vadd.f32 %v1290_v8, %v1289_v34  ;;  %v1167_v39 = vpop.permute.xlu0 %1166  ;;  %v819_v16 = vadd.f32 %v787_v33, %v623_v13  ;;  %v1072_v8 = vmax.f32 %v1040_v29, 0.0  ;;  %v2628_v34 = vld [vmem:[#allocation59_spill] sm:$0xff]  ;;  %v789_v61 = vmul.f32 %v2083_v4, %v2629_v28 }
 0x18f   : > { %v1142_v41 = vpop.permute.xlu1 %1141  ;;  %v1042_v54 = vadd.f32 %v2628_v34, %v818_v63  ;;  %v820_v56 = vadd.f32 %v788_v52, %v2327_v55  ;;  %v1073_v40 = vmax.f32 %v1041_v12, 0.0  ;;  %v433_v51 = vmul.f32 %v2068_v26, %v2634_v43  ;;  %v2638_v24 = vld [vmem:[#allocation43_spill] sm:$0xff] }
 0x190   : > { %v1291_v9 = vmul.f32 %v1142_v41, %v1067_v11  ;;  %v2630_v11 = vld [vmem:[#allocation24_spill] sm:$0xff]  ;;  %v1043_v41 = vadd.f32 %v2632_v14, %v819_v16  ;;  %v1296_v20 = vmul.f32 %v1167_v39, %v1072_v8  ;;  %v791_v32 = vmul.f32 %v2083_v4, %v2636_v17  ;;  %v2637_v39 = vld [vmem:[#allocation26_spill] sm:$0xff]  ;;  %v2640_v52 = vld [vmem:[#allocation7_spill] sm:$0xff] }
 0x191   : > { %v595_v36 = vmul.f32 %v2075_v31, %v2630_v11  ;;  %v792_v29 = vmul.f32 %v2083_v4, %v2638_v24  ;;  %v600_v63 = vmul.f32 %v2075_v31, %v2640_v52  ;;  %v435_v12 = vmul.f32 %v2068_v26, %v2641_v57  ;;  %v2647_v14 = vld [vmem:[#allocation46_spill] sm:$0xff]  ;;  %v2653_v24 = vld [vmem:[#allocation8_spill] sm:$0xff]  ;;  %v2655_v52 = vld [vmem:[#allocation65_spill] sm:$0xff] }
 0x192   : > { %v1322_v45 = vadd.f32 %v1321_v38, %v1291_v9  ;;  %v1177_v46 = vpop.permute.xlu0 %1176  ;;  %v790_v38 = vmul.f32 %v2083_v4, %v2631_v37  ;;  %v2633_v9 = vld [vmem:[#allocation6_spill] sm:$0xff]  ;;  %v2656_v57 = vld [vmem:[#allocation29_spill] sm:$0xff] }
 0x193   : > { %v1152_v53 = vpop.permute.xlu1 %1151  ;;  %v436_v58 = vmul.f32 %v2068_v26, %v2633_v9  ;;  %v627_v42 = vadd.f32 %v595_v36, %v431_v6 }
 0x194   : > { %v1293_v19 = vmul.f32 %v1152_v53, %v1069_v44  ;;  %v1323_v59 = vadd.f32 %v1322_v45, %v1292_v23  ;;  %v821_v44 = vadd.f32 %v789_v61, %v625_v10  ;;  %v1074_v23 = vmax.f32 %v1042_v54, 0.0  ;;  %v2635_v45 = vld [vmem:[#allocation60_spill] sm:$0xff]  ;;  %v2645_v54 = vld [vmem:[#allocation45_spill] sm:$0xff] }
 0x195   : > { %v1044_v0 = vadd.f32 %v2635_v45, %v820_v56  ;;  %v597_v53 = vmul.f32 %v2075_v31, %v2637_v39  ;;  %v2646_v61 = vld [vmem:[#allocation68_spill] sm:$0xff]  ;;  %v632_v56 = vadd.f32 %v600_v63, %v436_v58  ;;  %v2651_v45 = vld [vmem:[#allocation47_spill] sm:$0xff] }
 0x196   : > { %v1324_v27 = vadd.f32 %v1323_v59, %v1293_v19  ;;  %v1187_v48 = vpop.permute.xlu0 %1186  ;;  %v822_v19 = vadd.f32 %v790_v38, %v2348_v35  ;;  %v1075_v59 = vmax.f32 %v1043_v41, 0.0  ;;  %v1045_v33 = vadd.f32 %v2639_v5, %v821_v44 }
 0x197   : > { %v1162_v25 = vpop.permute.xlu1 %1161  ;;  %v1298_v30 = vmul.f32 %v1177_v46, %v1074_v23  ;;  %v1076_v10 = vmax.f32 %v1044_v0, 0.0  ;;  %v2644_v46 = vld [vmem:[#allocation28_spill] sm:$0xff]  ;;  %v437_v41 = vmul.f32 %v2068_v26, %v2647_v14  ;;  %v2650_v23 = vld [vmem:[#allocation30_spill] sm:$0xff]  ;;  %v796_v58 = vmul.f32 %v2083_v4, %v2651_v45  ;;  %v2665_v45 = vld [vmem:[#allocation69_spill] sm:$0xff] }
 0x198   : > { %v1295_v49 = vmul.f32 %v1162_v25, %v1071_v2  ;;  %v1325_v50 = vadd.f32 %v1324_v27, %v1294_v47  ;;  %v629_v2 = vadd.f32 %v597_v53, %v433_v51  ;;  %v823_v47 = vadd.f32 %v791_v32, %v627_v42  ;;  %v2643_v25 = vld [vmem:[#allocation25_spill] sm:$0xff]  ;;  %v2648_v42 = vld [vmem:[#allocation63_spill] sm:$0xff] }
 0x199   : > { %v1046_v6 = vadd.f32 %v2642_v18, %v822_v19  ;;  %v793_v8 = vmul.f32 %v2083_v4, %v2643_v25  ;;  %v599_v34 = vmul.f32 %v2075_v31, %v2644_v46  ;;  %v1077_v28 = vmax.f32 %v1045_v33, 0.0  ;;  %v2654_v19 = vld [vmem:[#allocation9_spill] sm:$0xff] }
 0x19a   : > { %v1326_v7 = vadd.f32 %v1325_v50, %v1295_v49  ;;  %v1197_v60 = vpop.permute.xlu0 %1196  ;;  %v794_v49 = vmul.f32 %v2083_v4, %v2645_v54  ;;  %v824_v50 = vadd.f32 %v792_v29, %v2357_v22  ;;  %v1047_v11 = vadd.f32 %v2646_v61, %v823_v47  ;;  %v2660_v54 = vld [vmem:[#allocation32_spill] sm:$0xff] }
 0x19b   : > { %v1172_v1 = vpop.permute.xlu1 %1171  ;;  %v1300_v36 = vmul.f32 %v1187_v48, %v1076_v10  ;;  %v1078_v9 = vmax.f32 %v1046_v6, 0.0  ;;  %v601_v48 = vmul.f32 %v2075_v31, %v2650_v23  ;;  %v438_v29 = vmul.f32 %v2068_v26, %v2653_v24 }
 0x19c   : > { %v1297_v13 = vmul.f32 %v1172_v1, %v1073_v40  ;;  %v1327_v55 = vadd.f32 %v1326_v7, %v1296_v20  ;;  %v631_v40 = vadd.f32 %v599_v34, %v435_v12  ;;  %v825_v20 = vadd.f32 %v793_v8, %v629_v2  ;;  %v2649_v1 = vld [vmem:[#allocation27_spill] sm:$0xff] }
 0x19d   : > { %v1048_v43 = vadd.f32 %v2648_v42, %v824_v50  ;;  %v795_v22 = vmul.f32 %v2083_v4, %v2649_v1  ;;  %v826_v0 = vadd.f32 %v794_v49, %v2384_v15  ;;  %v1302_v32 = vmul.f32 %v1197_v60, %v1078_v9  ;;  %v2657_v60 = vld [vmem:[#allocation48_spill] sm:$0xff]  ;;  %v2662_v42 = vld [vmem:[#allocation10_spill] sm:$0xff]  ;;  %v2664_v1 = vld [vmem:[#allocation31_spill] sm:$0xff] }
 0x19e   : > { %v1328_v3 = vadd.f32 %v1327_v55, %v1297_v13  ;;  %v1207_v62 = vpop.permute.xlu0 %1206  ;;  %v1079_v13 = vmax.f32 %v1047_v11, 0.0  ;;  %v2652_v55 = vld [vmem:[#allocation70_spill] sm:$0xff]  ;;  %v633_v5 = vadd.f32 %v601_v48, %v437_v41  ;;  %v797_v12 = vmul.f32 %v2083_v4, %v2656_v57  ;;  %v2661_v11 = vld [vmem:[#allocation67_spill] sm:$0xff] }
 0x19f   : > { %v1182_v27 = vpop.permute.xlu1 %1181  ;;  %v1049_v17 = vadd.f32 %v2652_v55, %v825_v20  ;;  %v827_v33 = vadd.f32 %v795_v22, %v631_v40  ;;  %v1050_v63 = vadd.f32 %v2655_v52, %v826_v0  ;;  %v439_v47 = vmul.f32 %v2068_v26, %v2657_v60  ;;  %v2666_v55 = vld [vmem:[#allocation50_spill] sm:$0xff] }
 0x1a0   : > { %v1299_v16 = vmul.f32 %v1182_v27, %v1075_v59  ;;  %v1329_v35 = vadd.f32 %v1328_v3, %v1298_v30  ;;  %v602_v59 = vmul.f32 %v2075_v31, %v2654_v19  ;;  %v1080_v3 = vmax.f32 %v1048_v43, 0.0  ;;  %v2658_v27 = vld [vmem:[#allocation49_spill] sm:$0xff] }
 0x1a1   : > { %v798_v10 = vmul.f32 %v2083_v4, %v2658_v27  ;;  %v828_v18 = vadd.f32 %v796_v58, %v632_v56  ;;  %v1081_v6 = vmax.f32 %v1049_v17, 0.0  ;;  %v603_v49 = vmul.f32 %v2075_v31, %v2660_v54  ;;  %v2667_v17 = vld [vmem:[#allocation51_spill] sm:$0xff]  ;;  %v2672_v54 = vld [vmem:[#allocation52_spill] sm:$0xff] }
 0x1a2   : > { %v1330_v37 = vadd.f32 %v1329_v35, %v1299_v16  ;;  %v1217_v38 = vpop.permute.xlu0 %1216  ;;  %v2659_v16 = vld [vmem:[#allocation71_spill] sm:$0xff]  ;;  %v1304_v25 = vmul.f32 %v1207_v62, %v1080_v3  ;;  %v634_v34 = vadd.f32 %v602_v59, %v438_v29  ;;  %v829_v50 = vadd.f32 %v797_v12, %v633_v5  ;;  %v2668_v5 = vld [vmem:[#allocation34_spill] sm:$0xff] }
 0x1a3   : > { %v1192_v7 = vpop.permute.xlu1 %1191  ;;  %v1051_v35 = vadd.f32 %v2659_v16, %v827_v33  ;;  %v1082_v61 = vmax.f32 %v1050_v63, 0.0  ;;  %v635_v14 = vadd.f32 %v603_v49, %v439_v47  ;;  %v440_v43 = vmul.f32 %v2068_v26, %v2662_v42 }
 0x1a4   : > { %v1301_v51 = vmul.f32 %v1192_v7, %v1077_v28  ;;  %v1331_v44 = vadd.f32 %v1330_v37, %v1300_v36  ;;  %v1052_v36 = vadd.f32 %v2661_v11, %v828_v18  ;;  %v830_v41 = vadd.f32 %v798_v10, %v634_v34  ;;  %v2669_v10 = vld [vmem:[#allocation12_spill] sm:$0xff]  ;;  %v2670_v18 = vld [vmem:[#allocation13_spill] sm:$0xff] }
 0x1a5   : > { %v1083_v56 = vmax.f32 %v1051_v35, 0.0  ;;  %v1053_v20 = vadd.f32 %v2325_v21, %v829_v50  ;;  %v1306_v7 = vmul.f32 %v1217_v38, %v1082_v61  ;;  %v799_v22 = vmul.f32 %v2083_v4, %v2664_v1  ;;  %v2671_v35 = vld [vmem:[#allocation33_spill] sm:$0xff] }
 0x1a6   : > { %v1332_v39 = vadd.f32 %v1331_v44, %v1301_v51  ;;  %v1227_v53 = vpop.permute.xlu0 %1226  ;;  %v2663_v51 = vld [vmem:[#allocation11_spill] sm:$0xff]  ;;  %v1084_v48 = vmax.f32 %v1052_v36, 0.0  ;;  %v1054_v58 = vadd.f32 %v2665_v45, %v830_v41  ;;  %v441_v21 = vmul.f32 %v2068_v26, %v2666_v55  ;;  %v2673_v50 = vld [vmem:[#allocation53_spill] sm:$0xff]  ;;  %v2674_v41 = vld [vmem:[#allocation36_spill] sm:$0xff] }
 0x1a7   : > { %v1202_v30 = vpop.permute.xlu1 %1201  ;;  %v604_v44 = vmul.f32 %v2075_v31, %v2663_v51  ;;  %v831_v38 = vadd.f32 %v799_v22, %v635_v14  ;;  %v605_v33 = vmul.f32 %v2075_v31, %v2668_v5  ;;  %v443_v49 = vmul.f32 %v2068_v26, %v2672_v54  ;;  %v2677_v45 = vld [vmem:[#allocation35_spill] sm:$0xff]  ;;  %v2678_v55 = vld [vmem:[#allocation54_spill] sm:$0xff] }
 0x1a8   : > { %v1303_v2 = vmul.f32 %v1202_v30, %v1079_v13  ;;  %v1333_v15 = vadd.f32 %v1332_v39, %v1302_v32  ;;  %v800_v32 = vmul.f32 %v2083_v4, %v2667_v17  ;;  %v1085_v39 = vmax.f32 %v1053_v20, 0.0  ;;  %v2680_v5 = vld [vmem:[#allocation38_spill] sm:$0xff] }
 0x1a9   : > { %v1308_v24 = vmul.f32 %v1227_v53, %v1084_v48  ;;  %v636_v59 = vadd.f32 %v604_v44, %v440_v43  ;;  %v1086_v3 = vmax.f32 %v1054_v58, 0.0  ;;  %v442_v53 = vmul.f32 %v2068_v26, %v2669_v10  ;;  %v2675_v44 = vld [vmem:[#allocation14_spill] sm:$0xff] }
 0x1aa   : > { %v1334_v8 = vadd.f32 %v1333_v15, %v1303_v2  ;;  %v1232_v46 = vpop.permute.xlu0 %1231  ;;  %v637_v15 = vadd.f32 %v605_v33, %v441_v21  ;;  %v444_v1 = vmul.f32 %v2068_v26, %v2675_v44  ;;  %v803_v58 = vmul.f32 %v2083_v4, %v2677_v45 }
 0x1ab   : > { %v1212_v28 = vpop.permute.xlu1 %1211  ;;  %v1309_v52 = vmul.f32 %v1232_v46, %v1085_v39  ;;  %v832_v27 = vadd.f32 %v800_v32, %v636_v59  ;;  %v445_v21 = vmul.f32 %v2068_v26, %v2678_v55  ;;  %v609_v33 = vmul.f32 %v2075_v31, %v2680_v5 }
 0x1ac   : > { %v1305_v37 = vmul.f32 %v1212_v28, %v1081_v6  ;;  %v1335_v40 = vadd.f32 %v1334_v8, %v1304_v25  ;;  %v606_v6 = vmul.f32 %v2075_v31, %v2670_v18  ;;  %v801_v25 = vmul.f32 %v2083_v4, %v2671_v35  ;;  %v2684_v35 = vld [vmem:[#allocation56_spill] sm:$0xff] }
 0x1ad   : > { %v802_v28 = vmul.f32 %v2083_v4, %v2673_v50 }
 0x1ae   : > { %v1336_v62 = vadd.f32 %v1335_v40, %v1305_v37  ;;  %v1237_v9 = vpop.permute.xlu0 %1236  ;;  %v833_v37 = vadd.f32 %v801_v25, %v637_v15  ;;  %v638_v14 = vadd.f32 %v606_v6, %v442_v53  ;;  %v2683_v53 = vld [vmem:[#allocation37_spill] sm:$0xff]  ;;  %v806_v25 = vmul.f32 %v2083_v4, %v2684_v35 }
 0x1af   : > { %v1222_v23 = vpop.permute.xlu1 %1221  ;;  %v1310_v57 = vmul.f32 %v1237_v9, %v1086_v3  ;;  %v805_v18 = vmul.f32 %v2083_v4, %v2683_v53 }
 0x1b0   : > { %v1307_v0 = vmul.f32 %v1222_v23, %v1083_v56  ;;  %v1337_v13 = vadd.f32 %v1336_v62, %v1306_v7  ;;  %v607_v56 = vmul.f32 %v2075_v31, %v2674_v41  ;;  %v834_v51 = vadd.f32 %v802_v28, %v638_v14  ;;  %v2676_v23 = vld [vmem:[#allocation15_spill] sm:$0xff]  ;;  %v2685_v14 = vld [vmem:[#allocation18_spill] sm:$0xff] }
 0x1b1   : > { %v608_v48 = vmul.f32 %v2075_v31, %v2676_v23  ;;  %v448_v41 = vmul.f32 %v2068_v26, %v2685_v14 }
 0x1b2   : > { %v1338_v29 = vadd.f32 %v1337_v13, %v1307_v0  ;;  %v1242_v19 = vpop.permute.xlu0 %1241  ;;  %v639_v62 = vadd.f32 %v607_v56, %v443_v49  ;;  %v2686_v56 = vld [vmem:[#allocation19_spill] sm:$0xff] }
 0x1b3   : > { %v986_v30 = vpop.permute.xlu1 %985  ;;  %v640_v59 = vadd.f32 %v608_v48, %v444_v1  ;;  %v2688_v48 = vld [vmem:[#allocation57_spill] sm:$0xff] }
 0x1b4   : > { %v1339_v63 = vadd.f32 %v1338_v29, %v1308_v24  ;;  %v1055_v2 = vadd.f32 %v986_v30, %v831_v38  ;;  %v2679_v38 = vld [vmem:[#allocation55_spill] sm:$0xff]  ;;  %v835_v29 = vadd.f32 %v803_v58, %v639_v62 }
 0x1b5   : > { %v804_v17 = vmul.f32 %v2083_v4, %v2679_v38 }
 0x1b6   : > { %v1340_v12 = vadd.f32 %v1339_v63, %v1309_v52  ;;  %v1087_v60 = vmax.f32 %v1055_v2, 0.0  ;;  %v1247_v47 = vpop.permute.xlu0 %1246  ;;  %v641_v52 = vadd.f32 %v609_v33, %v445_v21  ;;  %v1359_v33 = vstv %s1358_s16 }
 0x1b7   : > { %v991_v16 = vpop.permute.xlu1 %990  ;;  %v836_v15 = vadd.f32 %v804_v17, %v640_v59 }
 0x1b8   : > { %v1311_v8 = vmul.f32 %v1242_v19, %v1087_v60  ;;  %v1341_v46 = vadd.f32 %v1340_v12, %v1310_v57  ;;  %v1056_v34 = vadd.f32 %v991_v16, %v832_v27  ;;  %v2681_v57 = vld [vmem:[#allocation16_spill] sm:$0xff]  ;;  %v2682_v27 = vld [vmem:[#allocation17_spill] sm:$0xff] }
 0x1b9   : > { %v446_v12 = vmul.f32 %v2068_v26, %v2681_v57  ;;  %v610_v10 = vmul.f32 %v2075_v31, %v2682_v27 }
 0x1ba   : > { %v1342_v61 = vadd.f32 %v1341_v46, %v1311_v8  ;;  %v1088_v11 = vmax.f32 %v1056_v34, 0.0  ;;  %v1252_v36 = vpop.permute.xlu0 %1251  ;;  %v837_v34 = vadd.f32 %v805_v18, %v641_v52 }
 0x1bb   : > { %v996_v40 = vpop.permute.xlu1 %995  ;;  %v642_v49 = vadd.f32 %v610_v10, %v446_v12 }
 0x1bc   : > { %v1312_v20 = vmul.f32 %v1247_v47, %v1088_v11  ;;  %v1057_v7 = vadd.f32 %v996_v40, %v833_v37 }
 0x1bd   : > { %v838_v37 = vadd.f32 %v806_v25, %v642_v49 }
 0x1be   : > { %v1343_v9 = vadd.f32 %v1342_v61, %v1312_v20  ;;  %v1089_v42 = vmax.f32 %v1057_v7, 0.0  ;;  %v1257_v43 = vpop.permute.xlu0 %1256  ;;  %v612_v20 = vmul.f32 %v2075_v31, %v2686_v56 }
 0x1bf   : > { %v1001_v22 = vpop.permute.xlu1 %1000 }
 0x1c0   : > { %v1313_v0 = vmul.f32 %v1252_v36, %v1089_v42  ;;  %v1058_v13 = vadd.f32 %v1001_v22, %v834_v51  ;;  %v644_v22 = vadd.f32 %v612_v20, %v448_v41 }
 0x1c2   : > { %v1344_v32 = vadd.f32 %v1343_v9, %v1313_v0  ;;  %v1090_v39 = vmax.f32 %v1058_v13, 0.0  ;;  %v1262_v24 = vpop.permute.xlu0 %1261  ;;  %v2687_v9 = vld [vmem:[#allocation58_spill] sm:$0xff] }
 0x1c3   : > { %v1006_v19 = vpop.permute.xlu1 %1005  ;;  %v808_v42 = vmul.f32 %v2083_v4, %v2687_v9 }
 0x1c4   : > { %v1314_v30 = vmul.f32 %v1257_v43, %v1090_v39  ;;  %v1059_v3 = vadd.f32 %v1006_v19, %v835_v29 }
 0x1c5   : > { %v840_v58 = vadd.f32 %v808_v42, %v644_v22 }
 0x1c6   : > { %v1345_v63 = vadd.f32 %v1344_v32, %v1314_v30  ;;  %v1091_v2 = vmax.f32 %v1059_v3, 0.0  ;;  %v1267_v60 = vpop.permute.xlu0 %1266 }
 0x1c7   : > { %v1011_v47 = vpop.permute.xlu1 %1010 }
 0x1c8   : > { %v1315_v6 = vmul.f32 %v1262_v24, %v1091_v2  ;;  %v1060_v16 = vadd.f32 %v1011_v47, %v836_v15 }
 0x1ca   : > { %v1346_v8 = vadd.f32 %v1345_v63, %v1315_v6  ;;  %v1092_v46 = vmax.f32 %v1060_v16, 0.0  ;;  %v1272_v61 = vpop.permute.xlu0 %1271 }
 0x1cb   : > { %v1016_v54 = vpop.permute.xlu1 %1015 }
 0x1cc   : > { %v1316_v50 = vmul.f32 %v1267_v60, %v1092_v46  ;;  %v1061_v28 = vadd.f32 %v1016_v54, %v837_v34 }
 0x1ce   : > { %v1347_v11 = vadd.f32 %v1346_v8, %v1316_v50  ;;  %v1093_v36 = vmax.f32 %v1061_v28, 0.0  ;;  %v1277_v44 = vpop.permute.xlu0 %1276 }
 0x1cf   : > { %v1021_v40 = vpop.permute.xlu1 %1020 }
 0x1d0   : > { %v1317_v7 = vmul.f32 %v1272_v61, %v1093_v36  ;;  %v1062_v62 = vadd.f32 %v1021_v40, %v838_v37 }
 0x1d2   : > { %v1348_v43 = vadd.f32 %v1347_v11, %v1317_v7  ;;  %v1094_v51 = vmax.f32 %v1062_v62, 0.0  ;;  %v1287_v17 = vpop.permute.xlu0 %1286 }
 0x1d3   : > { %v1026_v1 = vpop.permute.xlu1 %1025 }
 0x1d4   : > { %v1318_v23 = vmul.f32 %v1277_v44, %v1094_v51  ;;  %v1063_v45 = vadd.f32 %v1026_v1, %v2688_v48 }
 0x1d6   : > { %v1349_v0 = vadd.f32 %v1348_v43, %v1318_v23  ;;  %v1095_v55 = vmax.f32 %v1063_v45, 0.0 }
 0x1d7   : > { %v1031_v13 = vpop.permute.xlu1 %1030 }
 0x1d8   : > { %v1064_v26 = vadd.f32 %v1031_v13, %v840_v58 }
 0x1da   : > { %v1096_v21 = vmax.f32 %v1064_v26, 0.0 }
 0x1db   : > { %v1282_v31 = vpop.permute.xlu1 %1281 }
 0x1dc   : > { %v1319_v38 = vmul.f32 %v1282_v31, %v1095_v55  ;;  %v1320_v32 = vmul.f32 %v1287_v17, %v1096_v21 }
 0x1de   : > { %v1350_v4 = vadd.f32 %v1349_v0, %v1319_v38 }
 0x1e0   : > { %v1351_v39 = vadd.f32 %v1350_v4, %v1320_v32 }
 0x1e2   : > { %v1352_v24 = vrot.slane %v1351_v39, 4 }
 0x1e4   : > { %v1353_v29 = vadd.f32 %v1352_v24, %v1351_v39 }
 0x1e6   : > { %v1354_v19 = vrot.slane %v1353_v29, 2 }
 0x1e8   : > { %v1355_v59 = vadd.f32 %v1354_v19, %v1353_v29 }
 0x1ea   : > { %v1356_v5 = vrot.slane %v1355_v59, 1 }
 0x1ec   : > { %v1357_v30 = vadd.f32 %v1356_v5, %v1355_v59 }
 0x1ee   : > { %v1360_v3 = vadd.f32 %v1359_v33, %v1357_v30 }
 0x1f0   : > { %v1441_v52 = vmul.f32 -1.442695, %v1360_v3 }
 0x1f2   : > { %1494 = vpow2.f32 %v1441_v52 }
 0x1fc   : > { %v1495_v63 = vpop.eup %1494 }
 0x1fd   : > { %v1364_v2 = vadd.f32 1.0, %v1495_v63 }
 0x1ff   : > { %1496 = vrcp.f32 %v1364_v2 }
 0x209   : > { %v1497_v15 = vpop.eup %1496 }
 0x20a   : > { %1367 = vst [vmem:[%s215_s19] sm:$0x1] %v1497_v15 }
 0x20b   : > { %1511 = shalt.err (!%p1508_p3)
}
 0x20c   : > { %s1512_s11 = scalar_lea.hbm %s2507_s6, 16  ;;  %s1516_s14 = scalar_lea.hbm %s2554_s5, 32 }
 0x20d   : > { %p1513_p4 = scmp.ne.s32.totalorder %s2507_s6, %s1512_s11  ;;  %p1517_p9 = scmp.lt.u32.totalorder %s2507_s6, %s2554_s5 }
 0x20e   : > { %p1518_p10 = scmp.lt.u32.totalorder %s1516_s14, %s1512_s11  ;;  %p1520_p12 = scmp.lt.u32.totalorder %s1512_s11, %s2507_s6 }
 0x20f   : > { %p1514_p7 = pnand %p1513_p4, %p1637_p5 }
 0x210   : > { %p1519_p11 = por %p1518_p10, %p1517_p9 }
 0x211   : > { %p1515_p8 = pneg %p1514_p7 }
 0x212   : > { %p1521_p13 = por %p1520_p12, %p1519_p11 }
 0x214   : > { %p1522_p0 = pnand %p1521_p13, %p1515_p8 }
 0x216   : > { %1525 = shalt.err (!%p1522_p0)
}
 0x217   : > { %1445 = dma.vmem_to_hbm [thread:$0]  (%p1637_p5), %s2509_s24, 16, %s2507_s6, %s1369_s7  }
 0x218 PF: > { %p1451_p1 = scmp.ge.s32.totalorder %s1560_s23, 2  ;;  %s1393_s17 = sand.u32 1, %s1548_s20  }
 0x219   : > { %s1394_s18 = scalar_lea.sflag [#allocation4], %s1393_s17 }
 0x21a   : > { %p1448_p2 = pnand %p1451_p1, %p1641_p6 }
 0x21c   : > { %1543 = dma.done.wait (!%p1448_p2), %s1394_s18, 16  }
 0x21d   : > { %1545 = vsyncadd (!%p1448_p2), %s1394_s18, 4294967280  ;;  %p16_p3 = scmp.ge.s32.totalorder %s1624_s25, 4   ;;  %s2689_s20 = smov %s1552_s21 }
 0x21e   : > { %s2690_s21 = smov %s1556_s22  ;;  %s2691_s22 = smov %s1635_s28 }
 0x21f   : > { %s2692_s23 = smov %s1624_s25  ;;  %18 = sbr.rel (!%p16_p3) target bundleno = 5 (0x5), region = 75 }
 0x226   :  { %1398 = vsyncpa [#allocation4], 1 }
 0x227   :  { %1400 = vsyncpa [#allocation4 + $0x1], 1 }

</bundles_post_ra>
